<compile_context>
chip_gen: v5e
topology: v5e:2x2
jax: 0.10.0
libtpu: 0.0.40
codegen_flags: <defaults>
</compile_context>

<pallas_src>
import functools

import numpy as np

import jax
import jax.numpy as jnp
from jax import lax
from jax.experimental import pallas as pl
from jax.experimental.pallas import tpu as pltpu


def _round_up(x, m):
    return ((x + m - 1) // m) * m


def _cdiv(a, b):
    return (a + b - 1) // b


def _interp_kernel(sp_ref, y_ref, out_ref, acc_ref, *, Bt, Ht, compute_dtype):
    """One (batch-chunk, P-tile, H-chunk) grid step.

    sp_ref  : (1, 2, Pt)    scaled sample coords u = xnew * (dim - 1)
    y_ref   : (Bt*Ht, W)    rows (batch-major, then h) of the original grid
    out_ref : (1, Bt, Pt)   interpolated values (written on the last H chunk)
    acc_ref : (Bt, Pt) f32  accumulator across H chunks
    """
    k = pl.program_id(2)

    @pl.when(k == 0)
    def _init():
        acc_ref[...] = jnp.zeros_like(acc_ref)

    Pt = sp_ref.shape[-1]
    W = y_ref.shape[-1]

    u = sp_ref[0]                      # (2, Pt)
    u0 = u[0:1, :]                     # (1, Pt)  row (H) coordinate
    u1 = u[1:2, :]                     # (1, Pt)  col (W) coordinate

    # Separable tent weights built from in-kernel iota (f32 on the VPU).
    h0 = (k * Ht).astype(jnp.float32)
    h_idx = lax.broadcasted_iota(jnp.int32, (Ht, Pt), 0).astype(jnp.float32) + h0
    w_idx = lax.broadcasted_iota(jnp.int32, (W, Pt), 0).astype(jnp.float32)
    tent_h = jnp.maximum(0.0, 1.0 - jnp.abs(h_idx - u0))       # (Ht, Pt) f32
    tent_w = jnp.maximum(0.0, 1.0 - jnp.abs(w_idx - u1))       # (W,  Pt) f32

    # Stage 1: contract W on the MXU.  M = Bt*Ht (batch folded in when shared),
    # N = Pt, K = W.  bf16 inputs, f32 accumulation.
    z = jnp.dot(y_ref[...].astype(compute_dtype),
                tent_w.astype(compute_dtype),
                preferred_element_type=jnp.float32)             # (Bt*Ht, Pt)

    # Stage 2: weighted reduce over the Ht rows of each batch element (f32).
    rows = []
    for bi in range(Bt):
        zb = z[bi * Ht:(bi + 1) * Ht, :]                        # (Ht, Pt)
        rows.append(jnp.sum(zb * tent_h, axis=0, keepdims=True))
    acc_ref[...] += jnp.concatenate(rows, axis=0) if Bt > 1 else rows[0]

    @pl.when(k == pl.num_programs(2) - 1)
    def _finalize():
        out_ref[0] = acc_ref[...].astype(out_ref.dtype)


def linear_interpolator_forward(y, sample_parameters, input_shape, output_shape,
                                *, compute_dtype=jnp.bfloat16,
                                _max_h_rows_per_step=None):
    """Pallas implementation of LinearInterpolator.forward (2-D bilinear).

    y                 : (B, H, W)
    sample_parameters : tuple; [0] broadcastable to (B, *output_shape, 2),
                        coordinates in [0, 1]
    compute_dtype     : dtype fed to the MXU contraction (bf16 by default for
                        ~3x MXU throughput; pass jnp.float32 for bit-accuracy).
    """
    xnew = sample_parameters[0]
    nd = len(input_shape)
    # TODO(synk): only the 2-D (H, W) case of the generic n-D module is implemented.
    assert nd == 2, "this kernel instantiates the 2-D (H, W) case"
    H, W = int(input_shape[0]), int(input_shape[1])
    assert max(H, W) < (1 << 24)       # grid indices must be exact in f32
    B = int(y.shape[0])
    P = int(np.prod(output_shape))
    out_dtype = y.dtype

    # Sample points shared across the batch (leading dim missing or == 1)?
    shared = (xnew.ndim == len(output_shape) + 1) or (int(xnew.shape[0]) == 1)

    scale = jnp.asarray([H - 1.0, W - 1.0], jnp.float32)
    if shared:
        xs = jnp.reshape(xnew.astype(jnp.float32), (P, nd)) * scale     # (P, 2)
        sp = jnp.transpose(xs)[None]                                    # (1, 2, P)
    else:
        xb = jnp.broadcast_to(xnew, (B,) + tuple(output_shape) + (nd,))
        xs = xb.reshape(B, P, nd).astype(jnp.float32) * scale
        sp = jnp.transpose(xs, (0, 2, 1))                               # (B, 2, P)

    # ---- generation-aware VMEM budget ------------------------------------
    try:
        vmem_cap = int(getattr(pltpu.get_tpu_info(), "vmem_capacity_bytes",
                               64 << 20))
    except Exception:
        vmem_cap = 64 << 20
    if vmem_cap >= (100 << 20):        # v5e / v6e: 128 MiB physical VMEM
        budget, vmem_limit = 20 << 20, 48 << 20
    else:                              # v7x-class: 64 MiB per TensorCore
        budget, vmem_limit = 10 << 20, 28 << 20

    ysz = y.dtype.itemsize
    osz = jnp.dtype(out_dtype).itemsize
    csz = jnp.dtype(compute_dtype).itemsize

    def est_bytes(bt, ht, pt):
        tents = (ht + W) * pt * (4 + csz)          # f32 build + compute-dtype copy
        z = bt * ht * pt * 4                       # stage-1 result
        yblk = bt * ht * W * (2 * ysz + csz)       # double-buffered block + cast
        spblk = 2 * 2 * pt * 4
        outblk = bt * pt * (2 * osz + 4)           # out block (x2) + accumulator
        return tents + z + yblk + spblk + outblk + (1 << 20)

    # ---- tile selection ----------------------------------------------------
    H8 = _round_up(H, 8)
    P128 = _round_up(P, 128)

    Pt = min(512, P128)                # matmul N: prefer a multiple of 256
    if Pt > 256 and est_bytes(1, H8, Pt) > budget:
        Pt = 256

    Ht = H8                            # H rows per reduction (K) chunk
    if _max_h_rows_per_step is not None:
        Ht = min(Ht, _round_up(int(_max_h_rows_per_step), 8))
    while Ht > 8 and est_bytes(1, Ht, Pt) > budget:
        Ht = _round_up(Ht // 2, 8)
    # TODO(synk): extremely wide W (W*Pt temporaries >> VMEM) would also need
    # matmul-K (W) tiling; not implemented.
    nH = _cdiv(H8, Ht)
    H_pad = nH * Ht

    Bt = 1                             # batch elements folded into the matmul M
    if shared and nH == 1:
        Bt = min(B, 8)                 # 8 already amortizes the tent build
        while Bt > 1 and est_bytes(Bt, Ht, Pt) > budget:
            Bt = (Bt + 1) // 2
    assert Bt == 1 or nH == 1
    Bo = _cdiv(B, Bt)
    B_pad = Bo * Bt

    nP = _cdiv(P, Pt)
    if Bo * nP == 1 and P128 >= 256:   # keep both v7x TensorCores busy
        Pt = _round_up(P128 // 2, 128)
        nP = _cdiv(P, Pt)
    P_pad = nP * Pt

    # ---- padded operands ---------------------------------------------------
    # Padded sample columns interpolate at (0, 0) and are sliced off below;
    # padded y rows (h >= H) always receive an exactly-zero tent weight.
    sp = jnp.pad(sp, ((0, 0), (0, 0), (0, P_pad - P)))
    y_p = jnp.pad(y, ((0, B_pad - B), (0, H_pad - H), (0, 0)))
    y2 = y_p.reshape(B_pad * H_pad, W)                 # native dtype, lane dim = W

    kernel = functools.partial(_interp_kernel, Bt=Bt, Ht=Ht,
                               compute_dtype=compute_dtype)
    sp_index = (lambda b, j, k: (0, 0, j)) if shared else (lambda b, j, k: (b, 0, j))

    out = pl.pallas_call(
        kernel,
        out_shape=jax.ShapeDtypeStruct((Bo, Bt, P_pad), out_dtype),
        grid_spec=pltpu.PrefetchScalarGridSpec(
            num_scalar_prefetch=0,
            grid=(Bo, nP, nH),
            in_specs=[
                pl.BlockSpec((1, nd, Pt), sp_index),
                pl.BlockSpec((Bt * Ht, W), lambda b, j, k: (b * nH + k, 0)),
            ],
            out_specs=pl.BlockSpec((1, Bt, Pt), lambda b, j, k: (b, 0, j)),
            scratch_shapes=[pltpu.VMEM((Bt, Pt), jnp.float32)],
        ),
        compiler_params=pltpu.CompilerParams(
            dimension_semantics=("parallel", "parallel", "arbitrary"),
            vmem_limit_bytes=vmem_limit,
        ),
    )(sp, y2)

    out = out.reshape(B_pad, P_pad)[:B, :P]
    return out.reshape((B,) + tuple(output_shape))


def _reference_forward(y, xnew, input_shape, output_shape):
    """Pure-JAX replica of the PyTorch n_linear_interp (2-D) for checking."""
    B = y.shape[0]
    nd = len(input_shape)
    P = int(np.prod(output_shape))
    xb = jnp.broadcast_to(xnew, (B,) + tuple(output_shape) + (nd,)).reshape(B, P, nd)
    dims_f = jnp.asarray(input_shape, jnp.float32)
    dims_i = jnp.asarray(input_shape, jnp.int32)
    raw = xb.astype(jnp.float32) * (dims_f - 1.0)
    left_f = jnp.floor(raw)
    off = raw - left_f
    left = left_f.astype(jnp.int32)
    right = jnp.where(left + 1 >= dims_i, left, left + 1)
    bidx = jnp.arange(B)[:, None]
    l0, l1 = left[..., 0], left[..., 1]
    r0, r1 = right[..., 0], right[..., 1]
    o0, o1 = off[..., 0], off[..., 1]
    v00 = y[bidx, l0, l1]
    v01 = y[bidx, l0, r1]
    v10 = y[bidx, r0, l1]
    v11 = y[bidx, r0, r1]
    # Same reduction order as the torch loop (dim 0 first, then dim 1).
    a = v00 + (v10 - v00) * o0
    b = v01 + (v11 - v01) * o0
    out = a + (b - a) * o1
    return out.reshape((B,) + tuple(output_shape))


if __name__ == "__main__":
    input_shape = (16, 16)
    output_shape = (8, 8)
    B = 2

    key = jax.random.PRNGKey(0)
    k1, k2, k3, k4, k5 = jax.random.split(key, 5)
    y = jax.random.normal(k1, (B,) + input_shape, dtype=jnp.float32)

    # Case 1: shared sample points, default bf16 MXU path (bf16 tolerance).
    xnew_shared = jax.random.uniform(
        k2, (1,) + output_shape + (len(input_shape),), dtype=jnp.float32)
    out = jax.block_until_ready(
        linear_interpolator_forward(y, (xnew_shared,), input_shape, output_shape))
    ref = _reference_forward(y, xnew_shared, input_shape, output_shape)
    np.testing.assert_allclose(np.asarray(out), np.asarray(ref), rtol=5e-2, atol=5e-2)

    # Same case with f32 compute to verify exactness of the formulation.
    out32 = jax.block_until_ready(linear_interpolator_forward(
        y, (xnew_shared,), input_shape, output_shape, compute_dtype=jnp.float32))
    np.testing.assert_allclose(np.asarray(out32), np.asarray(ref), rtol=1e-4, atol=1e-4)

    # Case 2: per-batch sample points (separable form keeps M = H, not 1).
    xnew_batch = jax.random.uniform(
        k3, (B,) + output_shape + (len(input_shape),), dtype=jnp.float32)
    out_b = jax.block_until_ready(
        linear_interpolator_forward(y, (xnew_batch,), input_shape, output_shape))
    ref_b = _reference_forward(y, xnew_batch, input_shape, output_shape)
    np.testing.assert_allclose(np.asarray(out_b), np.asarray(ref_b), rtol=5e-2, atol=5e-2)

    # Case 3: larger shared case exercising P tiling/padding, odd batch padding
    # and the H-chunk accumulation path (forced small H chunk), f32 compute.
    in3, out3, B3 = (32, 32), (24, 24), 3
    y3 = jax.random.normal(k4, (B3,) + in3, dtype=jnp.float32)
    xnew3 = jax.random.uniform(k5, (1,) + out3 + (2,), dtype=jnp.float32)
    xnew3 = xnew3.at[0, 0, 0, :].set(1.0)           # exercise the boundary clamp
    o3 = jax.block_until_ready(linear_interpolator_forward(
        y3, (xnew3,), in3, out3, compute_dtype=jnp.float32, _max_h_rows_per_step=8))
    r3 = _reference_forward(y3, xnew3, in3, out3)
    np.testing.assert_allclose(np.asarray(o3), np.asarray(r3), rtol=1e-4, atol=1e-4)

    print("KERNEL_OK")
</pallas_src>

<mosaic_0001>
module attributes {stable_mosaic.version = 11 : i64} {
  func.func @_interp_kernel(%arg0: i32, %arg1: i32, %arg2: i32, %arg3: memref<1x2x128xf32, #tpu.memory_space<vmem>>, %arg4: memref<32x16xf32, #tpu.memory_space<vmem>>, %arg5: memref<1x2x128xf32, #tpu.memory_space<vmem>>, %arg6: memref<2x128xf32, #tpu.memory_space<vmem>>) attributes {dimension_semantics = [#tpu.dimension_semantics<parallel>, #tpu.dimension_semantics<parallel>, #tpu.dimension_semantics<arbitrary>], iteration_bounds = array<i64: 1, 1, 1>, scalar_prefetch = 0 : i64, scratch_operands = 1 : i64, tpu.core_type = #tpu.core_type<tc>, window_params = [{transform_indices = @transform_0, window_bounds = array<i64: 1, 2, 128>}, {transform_indices = @transform_1, window_bounds = array<i64: 32, 16>}, {transform_indices = @transform_2, window_bounds = array<i64: 1, 2, 128>}]} {
    %c0_i32 = arith.constant 0 : i32
    %0 = arith.cmpi eq, %arg2, %c0_i32 : i32
    %1 = arith.extui %0 : i1 to i32
    %c0_i32_0 = arith.constant 0 : i32
    %2 = arith.cmpi ne, %1, %c0_i32_0 : i32
    scf.if %2 {
      %cst_17 = arith.constant 0.000000e+00 : f32
      %48 = vector.broadcast %cst_17 : f32 to vector<2x128xf32>
      %c0_18 = arith.constant 0 : index
      %c0_19 = arith.constant 0 : index
      %49 = vector.load %arg6[%c0_18, %c0_19] : memref<2x128xf32, #tpu.memory_space<vmem>>, vector<2x128xf32>
      tpu.vector_store %arg6[%c0_18, %c0_19], %48 {strides = array<i32>} : memref<2x128xf32, #tpu.memory_space<vmem>>, vector<2x128xf32>,
    } else {
    }
    %c0 = arith.constant 0 : index
    %c0_1 = arith.constant 0 : index
    %c0_2 = arith.constant 0 : index
    %3 = vector.load %arg3[%c0, %c0_1, %c0_2] : memref<1x2x128xf32, #tpu.memory_space<vmem>>, vector<1x2x128xf32>
    %4 = vector.shape_cast %3 : vector<1x2x128xf32> to vector<2x128xf32>
    %5 = vector.extract_strided_slice %4 {offsets = [0, 0], sizes = [1, 128], strides = [1, 1]} : vector<2x128xf32> to vector<1x128xf32>
    %6 = vector.extract_strided_slice %4 {offsets = [1, 0], sizes = [1, 128], strides = [1, 1]} : vector<2x128xf32> to vector<1x128xf32>
    %c16_i32 = arith.constant 16 : i32
    %7 = arith.muli %arg2, %c16_i32 : i32
    %8 = arith.sitofp %7 : i32 to f32
    %9 = tpu.iota {dimensions = array<i32: 0>} : vector<16x128xi32>
    %10 = arith.sitofp %9 : vector<16x128xi32> to vector<16x128xf32>
    %11 = vector.broadcast %8 : f32 to vector<16x128xf32>
    %12 = arith.addf %10, %11 : vector<16x128xf32>
    %13 = tpu.iota {dimensions = array<i32: 0>} : vector<16x128xi32>
    %14 = arith.sitofp %13 : vector<16x128xi32> to vector<16x128xf32>
    %15 = vector.broadcast %5 : vector<1x128xf32> to vector<16x128xf32>
    %16 = arith.subf %12, %15 : vector<16x128xf32>
    %17 = math.absf %16 : vector<16x128xf32>
    %cst = arith.constant 1.000000e+00 : f32
    %18 = vector.broadcast %cst : f32 to vector<16x128xf32>
    %19 = arith.subf %18, %17 : vector<16x128xf32>
    %cst_3 = arith.constant 0.000000e+00 : f32
    %20 = vector.broadcast %cst_3 : f32 to vector<16x128xf32>
    %21 = arith.maximumf %20, %19 : vector<16x128xf32>
    %22 = vector.broadcast %6 : vector<1x128xf32> to vector<16x128xf32>
    %23 = arith.subf %14, %22 : vector<16x128xf32>
    %24 = math.absf %23 : vector<16x128xf32>
    %cst_4 = arith.constant 1.000000e+00 : f32
    %25 = vector.broadcast %cst_4 : f32 to vector<16x128xf32>
    %26 = arith.subf %25, %24 : vector<16x128xf32>
    %cst_5 = arith.constant 0.000000e+00 : f32
    %27 = vector.broadcast %cst_5 : f32 to vector<16x128xf32>
    %28 = arith.maximumf %27, %26 : vector<16x128xf32>
    %c0_6 = arith.constant 0 : index
    %c0_7 = arith.constant 0 : index
    %29 = vector.load %arg4[%c0_6, %c0_7] : memref<32x16xf32, #tpu.memory_space<vmem>>, vector<32x16xf32>
    %30 = arith.truncf %29 : vector<32x16xf32> to vector<32x16xbf16>
    %31 = arith.truncf %28 : vector<16x128xf32> to vector<16x128xbf16>
    %cst_8 = arith.constant dense<0.000000e+00> : vector<32x128xf32>
    %32 = tpu.matmul %30, %31, %cst_8 {dimension_numbers = #tpu.dot_dimension_numbers<[1], [0], [0], [1], [0, 0, 1, 1], [], []>} : vector<32x16xbf16>, vector<16x128xbf16>, vector<32x128xf32> -> vector<32x128xf32>
    %33 = vector.extract_strided_slice %32 {offsets = [0, 0], sizes = [16, 128], strides = [1, 1]} : vector<32x128xf32> to vector<16x128xf32>
    %34 = arith.mulf %33, %21 : vector<16x128xf32>
    %cst_9 = arith.constant dense<0.000000e+00> : vector<128xf32>
    %35 = vector.multi_reduction <add>, %34, %cst_9 [0] : vector<16x128xf32> to vector<128xf32>
    %36 = vector.shape_cast %35 : vector<128xf32> to vector<1x128xf32>
    %37 = vector.extract_strided_slice %32 {offsets = [16, 0], sizes = [16, 128], strides = [1, 1]} : vector<32x128xf32> to vector<16x128xf32>
    %38 = arith.mulf %37, %21 : vector<16x128xf32>
    %cst_10 = arith.constant dense<0.000000e+00> : vector<128xf32>
    %39 = vector.multi_reduction <add>, %38, %cst_10 [0] : vector<16x128xf32> to vector<128xf32>
    %40 = vector.shape_cast %39 : vector<128xf32> to vector<1x128xf32>
    %c0_11 = arith.constant 0 : index
    %c0_12 = arith.constant 0 : index
    %41 = vector.load %arg6[%c0_11, %c0_12] : memref<2x128xf32, #tpu.memory_space<vmem>>, vector<2x128xf32>
    %42 = tpu.concatenate %36, %40 in 0 : vector<1x128xf32>, vector<1x128xf32> -> vector<2x128xf32>
    %43 = arith.addf %41, %42 : vector<2x128xf32>
    %c0_13 = arith.constant 0 : index
    %c0_14 = arith.constant 0 : index
    %44 = vector.load %arg6[%c0_13, %c0_14] : memref<2x128xf32, #tpu.memory_space<vmem>>, vector<2x128xf32>
    tpu.vector_store %arg6[%c0_13, %c0_14], %43 {strides = array<i32>} : memref<2x128xf32, #tpu.memory_space<vmem>>, vector<2x128xf32>,
    %c0_i32_15 = arith.constant 0 : i32
    %45 = arith.cmpi eq, %arg2, %c0_i32_15 : i32
    %46 = arith.extui %45 : i1 to i32
    %c0_i32_16 = arith.constant 0 : i32
    %47 = arith.cmpi ne, %46, %c0_i32_16 : i32
    scf.if %47 {
      %c0_17 = arith.constant 0 : index
      %c0_18 = arith.constant 0 : index
      %48 = vector.load %arg6[%c0_17, %c0_18] : memref<2x128xf32, #tpu.memory_space<vmem>>, vector<2x128xf32>
      %c0_19 = arith.constant 0 : index
      %c0_20 = arith.constant 0 : index
      %c0_21 = arith.constant 0 : index
      %49 = vector.load %arg5[%c0_19, %c0_20, %c0_21] : memref<1x2x128xf32, #tpu.memory_space<vmem>>, vector<1x2x128xf32>
      %50 = vector.shape_cast %49 : vector<1x2x128xf32> to vector<2x128xf32>
      %51 = vector.shape_cast %48 : vector<2x128xf32> to vector<1x2x128xf32>
      tpu.vector_store %arg5[%c0_19, %c0_20, %c0_21], %51 {strides = array<i32>} : memref<1x2x128xf32, #tpu.memory_space<vmem>>, vector<1x2x128xf32>,
    } else {
    }
    return
  }
  func.func @transform_0(%arg0: i32, %arg1: i32, %arg2: i32) -> (i32, i32, i32) {
    %c0_i32 = arith.constant 0 : i32
    %c0_i32_0 = arith.constant 0 : i32
    %c0_i32_1 = arith.constant 0 : i32
    return %c0_i32, %c0_i32_0, %arg1 : i32, i32, i32
  }
  func.func @transform_1(%arg0: i32, %arg1: i32, %arg2: i32) -> (i32, i32) {
    %c1_i32 = arith.constant 1 : i32
    %0 = arith.muli %arg0, %c1_i32 : i32
    %1 = arith.addi %0, %arg2 : i32
    %c0_i32 = arith.constant 0 : i32
    %c0_i32_0 = arith.constant 0 : i32
    return %1, %c0_i32 : i32, i32
  }
  func.func @transform_2(%arg0: i32, %arg1: i32, %arg2: i32) -> (i32, i32, i32) {
    %c0_i32 = arith.constant 0 : i32
    %c0_i32_0 = arith.constant 0 : i32
    return %arg0, %c0_i32, %arg1 : i32, i32, i32
  }
}

</mosaic_0001>

<bundles_post_ra>
// kernel: tpu_custom_call.1
= control target key start
LH: loop header
LB: loop body
LE: loop exit
PB: predicated region body
PF: predicated region fallthrough
CT: control target
= control target key end

     0   :  { %v43_v1 = vlaneseq  ;;  %s218_s0 = inlined_call_operand.vmem [shape: f32[1,2,128], index: 0, kind: input, shape index: {}]   ;;  %s219_s1 = inlined_call_operand.vmem [shape: f32[32,16], index: 1, kind: input, shape index: {}]   ;;  %s220_s2 = inlined_call_operand.hbm [shape: f32[1,2,128], index: 2, kind: output, shape index: {}]  }
   0x1   :  { %v40_v0 = vld [vmem:[%s218_s0] sm:$0x3] }
   0x2   :  { %7 = vsyncpa [#allocation4], 0  ;;  %v44_v2 = vshrl.u32 %v43_v1, 7  ;;  %v60_v3 = vperm.slane %v40_v0, 1  ;;  %v51_v4 = vperm.slane %v40_v0, 0  ;;  %v69_v16 = vld [vmem:[%s219_s1] sm:$0xff] }
   0x3   :  { %v70_v18 = vld [vmem:[%s219_s1 + $0x8] sm:$0xff]  ;;  %v71_v19 = vld [vmem:[%s219_s1 + $0x10] sm:$0xff]  ;;  %v72_v20 = vld [vmem:[%s219_s1 + $0x18] sm:$0xff]  ;;  %vm76_vm0 = vcmask 130048   ;;  %v183_v24 = vmov 0.0   ;;  %vm121_vm1 = vcmask 1040384  }
   0x4   :  { %v45_v5 = vadd.s32 8, %v44_v2  ;;  %v46_v6 = vcvt.s32.f32 %v44_v2  ;;  %v73_v22 = vpack.c.bf16 %v70_v18, %v69_v16  ;;  %v74_v23 = vpack.c.bf16 %v72_v20, %v71_v19  ;;  %39 = vst [vmem:[#allocation2] sm:$0x3] %v183_v24  ;;  %s184_s1 = smov [#allocation3]   ;;  %s137_s21 = sshll.u32 %s220_s2, 4  ;;  %s138_s21 = int_to_ptr.hbm [resolvable:$true] %s137_s21 }
   0x5   :  { %s135_s18 = sshll.u32 %s184_s1, 4  ;;  %s136_s18 = int_to_ptr.vmem [resolvable:$true] %s135_s18 }
   0x6   :  { %v47_v7 = vcvt.s32.f32 %v45_v5  ;;  %v61_v8 = vsub.f32 %v46_v6, %v60_v3  ;;  %v52_v9 = vsub.f32 %v46_v6, %v51_v4 }
   0x8   :  { %v62_v10 = vsub.f32 %v47_v7, %v60_v3  ;;  %v63_v11 = vand.u32 2147483647, %v61_v8  ;;  %v53_v25 = vsub.f32 %v47_v7, %v51_v4  ;;  %v54_v26 = vand.u32 2147483647, %v52_v9 }
   0xa   :  { %v64_v12 = vand.u32 2147483647, %v62_v10  ;;  %v65_v13 = vsub.f32 1.0, %v63_v11  ;;  %v55_v27 = vand.u32 2147483647, %v53_v25  ;;  %v56_v30 = vsub.f32 1.0, %v54_v26 }
   0xb   :  { %v120_v54 = vld [vmem:[#allocation2] sm:$0x3] }
   0xc   :  { %v66_v14 = vsub.f32 1.0, %v64_v12  ;;  %v67_v15 = vmax.f32 %v65_v13, 0.0  ;;  %v57_v31 = vsub.f32 1.0, %v55_v27  ;;  %v58_v32 = vmax.f32 %v56_v30, 0.0 }
   0xe   :  { %v68_v17 = vmax.f32 %v66_v14, 0.0  ;;  %v59_v33 = vmax.f32 %v57_v31, 0.0 }
  0x10   :  { %v75_v21 = vpack.c.bf16 %v68_v17, %v67_v15 }
  0x12   :  { %90 = vmatpush.bf16.msra.mxu0 %v75_v21  ;;  %154 = vmatpush.bf16.msra.mxu1 %v75_v21 }
  0x15   :  { %152 = vmatmul.msk.bf16.vlgmr.msra.gmra.mxu0 %vm76_vm0, %v73_v22  ;;  %153 = vmatmul.msk.bf16.vlgmr.msra.gmra.mxu1 %vm76_vm0, %v74_v23 }
  0x92   :  { %v92_v28 = vpop.f32.mrf.mxu0  ;;  %v97_v29 = vpop.f32.mrf.mxu1 }
  0x93   :  { %v102_v36 = vmul.f32 %v92_v28, %v58_v32  ;;  %v111_v37 = vmul.f32 %v97_v29, %v58_v32 }
  0x9a   :  { %v94_v34 = vpop.f32.mrf.mxu0  ;;  %v99_v35 = vpop.f32.mrf.mxu1 }
  0x9b   :  { %v103_v38 = vmul.f32 %v94_v34, %v59_v33  ;;  %v112_v39 = vmul.f32 %v99_v35, %v59_v33 }
  0x9d   :  { %v104_v40 = vadd.f32 %v103_v38, %v102_v36  ;;  %v113_v41 = vadd.f32 %v112_v39, %v111_v37 }
  0x9f   :  { %v105_v42 = vrot.slane %v104_v40, 4  ;;  %v114_v43 = vrot.slane %v113_v41, 4 }
  0xa1   :  { %v106_v44 = vadd.f32 %v105_v42, %v104_v40  ;;  %v115_v45 = vadd.f32 %v114_v43, %v113_v41 }
  0xa3   :  { %v107_v46 = vrot.slane %v106_v44, 2  ;;  %v116_v47 = vrot.slane %v115_v45, 2 }
  0xa5   :  { %v108_v48 = vadd.f32 %v107_v46, %v106_v44  ;;  %v117_v49 = vadd.f32 %v116_v47, %v115_v45 }
  0xa7   :  { %v109_v50 = vrot.slane %v108_v48, 1  ;;  %v118_v51 = vrot.slane %v117_v49, 1 }
  0xa9   :  { %v110_v52 = vadd.f32 %v109_v50, %v108_v48  ;;  %v119_v53 = vadd.f32 %v118_v51, %v117_v49 }
  0xab   :  { %v122_v55 = vsel %vm121_vm1, %v110_v52, %v119_v53 }
  0xac   :  { %v123_v56 = vadd.f32 %v122_v55, %v120_v54 }
  0xae   :  { %124 = vst [vmem:[#allocation2] sm:$0x3] %v123_v56 }
  0xb5   :  { %v128_v57 = vld [vmem:[#allocation2] sm:$0x3] }
  0xb6   :  { %129 = vst [vmem:[#allocation3] sm:$0x3] %v128_v57 }
  0xb7   :  { %140 = dma.vmem_to_hbm [thread:$0]  %s136_s18, 32, %s138_s21, [#allocation4]  }
  0xb8   :  { %181 = dma.done.wait [#allocation4], 32  }
  0xb9   :  { %182 = vsyncadd [#allocation4], 4294967264 }
  0xba   :  { %145 = vsyncpa [#allocation4], 1 }

</bundles_post_ra>
